<compile_context>
chip_gen: v6e
topology: v6e:2x2x1
jax: 0.10.0
libtpu: 0.0.40
codegen_flags: <defaults>
</compile_context>

<pallas_src>
import functools

import jax
import jax.numpy as jnp
from jax.experimental import pallas as pl
from jax.experimental.pallas import tpu as pltpu


def _bottleneck_kernel(x_ref, w_ref, o_ref):
    # x_ref: (1, C, T) VMEM tile (channels on sublanes, spatial on lanes)
    # w_ref: (C,) SMEM scalar weights of the 1x1 conv (single output channel)
    # o_ref: (1, C, T) output tile (reduced map broadcast across channels)
    C = x_ref.shape[1]
    x = x_ref[0]                                   # (C, T)
    s = w_ref[0] * x[0:1, :]                       # (1, T) -- VPU scalar*vector
    for c in range(1, C):                          # small static unroll over C
        s = s + w_ref[c] * x[c:c + 1, :]
    o_ref[...] = jnp.broadcast_to(s, o_ref.shape).astype(o_ref.dtype)


def _choose_tile_hw(HW, C, itemsize, B, max_block_bytes=4 << 20):
    """Largest lane-aligned tile (multiple of 128 dividing HW) within budget."""
    if HW % 128 != 0:
        # Ragged spatial extent: use the full axis (allowed when the block dim
        # equals the array dim) -- avoids any jnp.pad copy.
        return HW
    t = HW
    while (C * t * itemsize > max_block_bytes) and (t % 256 == 0):
        t //= 2
    # Keep at least 2 grid steps so both v7x TensorCores get work.
    if B * (HW // t) < 2 and t % 256 == 0:
        t //= 2
    return t


@jax.jit
def bottleneck_layer(x_nchw, weight):
    """Pallas implementation of BottleneckLayer.forward.

    x_nchw : (B, C, H, W) float32
    weight : (1, C, 1, 1) float32  -- torch.nn.Conv2d(C, 1, 1, bias=False).weight
    returns: (B, C, H, W) float32
    """
    B, C, H, W = x_nchw.shape
    HW = H * W

    x_view = x_nchw.reshape(B, C, HW)          # free view, no HBM traffic
    w = weight.reshape(C)                      # (C,) scalar weights -> SMEM

    t_hw = _choose_tile_hw(HW, C, jnp.dtype(x_nchw.dtype).itemsize, B)
    grid = (B, HW // t_hw)

    out_view = pl.pallas_call(
        _bottleneck_kernel,
        out_shape=jax.ShapeDtypeStruct((B, C, HW), x_nchw.dtype),
        grid_spec=pltpu.PrefetchScalarGridSpec(
            num_scalar_prefetch=0,
            grid=grid,
            in_specs=[
                pl.BlockSpec((1, C, t_hw), lambda b, j: (b, 0, j)),
                pl.BlockSpec(memory_space=pltpu.MemorySpace.SMEM),
            ],
            out_specs=pl.BlockSpec((1, C, t_hw), lambda b, j: (b, 0, j)),
        ),
        compiler_params=pltpu.CompilerParams(
            dimension_semantics=("parallel", "parallel")),
    )(x_view, w)

    return out_view.reshape(B, C, H, W)        # free view back to NCHW


if __name__ == "__main__":
    key = jax.random.PRNGKey(0)
    k_x, k_w = jax.random.split(key)

    B, C, H, W = 2, 4, 16, 16
    x = jax.random.normal(k_x, (B, C, H, W), dtype=jnp.float32)
    # Deterministic init matching Conv2d(C, 1, 1, bias=False).weight shape.
    weight = jax.random.normal(k_w, (1, C, 1, 1), dtype=jnp.float32) * (1.0 / jnp.sqrt(C))

    out = bottleneck_layer(x, weight)
    jax.block_until_ready(out)

    # Reference: 1x1 conv (single out channel) == channel dot, repeat over C.
    s_ref = jnp.einsum("bchw,c->bhw", x, weight.reshape(C))
    ref = jnp.broadcast_to(s_ref[:, None, :, :], (B, C, H, W))
    assert out.shape == (B, C, H, W)
    assert jnp.allclose(out, ref, atol=1e-5, rtol=1e-5)

    print("KERNEL_OK")
</pallas_src>

<mosaic_0001>
module attributes {stable_mosaic.version = 11 : i64} {
  func.func @_bottleneck_kernel(%arg0: i32, %arg1: i32, %arg2: memref<1x4x256xf32, #tpu.memory_space<vmem>>, %arg3: memref<4xf32, #tpu.memory_space<smem>>, %arg4: memref<1x4x256xf32, #tpu.memory_space<vmem>>) attributes {dimension_semantics = [#tpu.dimension_semantics<parallel>, #tpu.dimension_semantics<parallel>], iteration_bounds = array<i64: 2, 1>, scalar_prefetch = 0 : i64, scratch_operands = 0 : i64, tpu.core_type = #tpu.core_type<tc>, window_params = [{transform_indices = @transform_0, window_bounds = array<i64: 1, 4, 256>}, {transform_indices = @transform_1, window_bounds = array<i64: 4>}, {transform_indices = @transform_2, window_bounds = array<i64: 1, 4, 256>}]} {
    %c0 = arith.constant 0 : index
    %c0_0 = arith.constant 0 : index
    %c0_1 = arith.constant 0 : index
    %0 = vector.load %arg2[%c0, %c0_0, %c0_1] : memref<1x4x256xf32, #tpu.memory_space<vmem>>, vector<1x4x256xf32>
    %1 = vector.shape_cast %0 : vector<1x4x256xf32> to vector<4x256xf32>
    %c0_2 = arith.constant 0 : index
    %2 = memref.load %arg3[%c0_2] : memref<4xf32, #tpu.memory_space<smem>>
    %3 = vector.extract_strided_slice %1 {offsets = [0, 0], sizes = [1, 256], strides = [1, 1]} : vector<4x256xf32> to vector<1x256xf32>
    %4 = vector.broadcast %2 : f32 to vector<1x256xf32>
    %5 = arith.mulf %4, %3 : vector<1x256xf32>
    %c1 = arith.constant 1 : index
    %6 = memref.load %arg3[%c1] : memref<4xf32, #tpu.memory_space<smem>>
    %7 = vector.extract_strided_slice %1 {offsets = [1, 0], sizes = [1, 256], strides = [1, 1]} : vector<4x256xf32> to vector<1x256xf32>
    %8 = vector.broadcast %6 : f32 to vector<1x256xf32>
    %9 = arith.mulf %8, %7 : vector<1x256xf32>
    %10 = arith.addf %5, %9 : vector<1x256xf32>
    %c2 = arith.constant 2 : index
    %11 = memref.load %arg3[%c2] : memref<4xf32, #tpu.memory_space<smem>>
    %12 = vector.extract_strided_slice %1 {offsets = [2, 0], sizes = [1, 256], strides = [1, 1]} : vector<4x256xf32> to vector<1x256xf32>
    %13 = vector.broadcast %11 : f32 to vector<1x256xf32>
    %14 = arith.mulf %13, %12 : vector<1x256xf32>
    %15 = arith.addf %10, %14 : vector<1x256xf32>
    %c3 = arith.constant 3 : index
    %16 = memref.load %arg3[%c3] : memref<4xf32, #tpu.memory_space<smem>>
    %17 = vector.extract_strided_slice %1 {offsets = [3, 0], sizes = [1, 256], strides = [1, 1]} : vector<4x256xf32> to vector<1x256xf32>
    %18 = vector.broadcast %16 : f32 to vector<1x256xf32>
    %19 = arith.mulf %18, %17 : vector<1x256xf32>
    %20 = arith.addf %15, %19 : vector<1x256xf32>
    %21 = vector.shape_cast %20 : vector<1x256xf32> to vector<1x1x256xf32>
    %22 = vector.broadcast %21 : vector<1x1x256xf32> to vector<1x4x256xf32>
    %c0_3 = arith.constant 0 : index
    %c0_4 = arith.constant 0 : index
    %c0_5 = arith.constant 0 : index
    %23 = vector.load %arg4[%c0_3, %c0_4, %c0_5] : memref<1x4x256xf32, #tpu.memory_space<vmem>>, vector<1x4x256xf32>
    tpu.vector_store %arg4[%c0_3, %c0_4, %c0_5], %22 {strides = array<i32>} : memref<1x4x256xf32, #tpu.memory_space<vmem>>, vector<1x4x256xf32>,
    return
  }
  func.func @transform_0(%arg0: i32, %arg1: i32) -> (i32, i32, i32) {
    %c0_i32 = arith.constant 0 : i32
    %c0_i32_0 = arith.constant 0 : i32
    return %arg0, %c0_i32, %arg1 : i32, i32, i32
  }
  func.func @transform_1(%arg0: i32, %arg1: i32) -> i32 {
    %c0_i32 = arith.constant 0 : i32
    %c0_i32_0 = arith.constant 0 : i32
    return %c0_i32 : i32
  }
  func.func @transform_2(%arg0: i32, %arg1: i32) -> (i32, i32, i32) {
    %c0_i32 = arith.constant 0 : i32
    %c0_i32_0 = arith.constant 0 : i32
    return %arg0, %c0_i32, %arg1 : i32, i32, i32
  }
}

</mosaic_0001>

<bundles_post_ra>
// kernel: bottleneck_layer.1
= control target key start
LH: loop header
LB: loop body
LE: loop exit
PB: predicated region body
PF: predicated region fallthrough
CT: control target
= control target key end

     0   :  { %7 = vsyncpa [#allocation3], 0  ;;  %s463_s9 = smov 0   ;;  %s465_s10 = smov 0   ;;  %s525_s0 = inlined_call_operand.vmem [shape: f32[2,4,256], index: 0, kind: input, shape index: {}]   ;;  %s526_s1 = inlined_call_operand.vmem [shape: f32[4], index: 1, kind: input, shape index: {}]   ;;  %s527_s2 = inlined_call_operand.vmem [shape: f32[2,4,256], index: 2, kind: output, shape index: {}]  }
   0x1   :  { %s467_s11 = smov 0  }
   0x2 LB: > { %s348_s12 = sadd.s32 4294967295, %s445_s11   ;;  %s25_s13 = sadd.s32 1, %s441_s10  ;;  %s445_s11 = sphi %s467_s11, %s13_s11   ;;  %s441_s10 = sphi %s465_s10, %s531_s10   ;;  %s437_s9 = sphi %s463_s9, %s530_s9  }
   0x3   : > { %p27_p0 = scmp.ge.s32.totalorder %s25_s13, 2  ;;  %p350_p1 = scmp.ge.s32.totalorder %s445_s11, 1 }
   0x4   : > { %p107_p2 = scmp.lt.s32.totalorder %s445_s11, 3  ;;  %p488_p4 = scmp.eq.s32.totalorder %s348_s12, 0 }
   0x5   : > { %s533_s13 = smov (%p27_p0, %s25_s13), 0  ;;  %s120_s18 = sshll.u32 %s526_s1, 4  ;;  %s121_s18 = int_to_ptr.vmem [resolvable:$true] %s120_s18 }
   0x6   : > { %p484_p3 = pnand %p350_p1, %p107_p2  ;;  %s404_s19 = scalar_lea.vmem %s121_s18, 16 }
   0x7   : > { %p405_p7 = scmp.ne.s32.totalorder %s121_s18, %s404_s19  ;;  %p412_p11 = scmp.lt.s32.totalorder %s121_s18, %s121_s18 }
   0x8   : > { %p373_p5 = pneg %p484_p3  ;;  %p413_p12 = scmp.lt.s32.totalorder %s404_s19, %s404_s19 }
   0xa   : > { %p374_p6 = pnand %p488_p4, %p373_p5  ;;  %p414_p13 = por %p413_p12, %p412_p11 }
   0xc   : > { %p406_p8 = pneg %p374_p6 }
   0xe   : > { %p407_p9 = pnand %p406_p8, %p405_p7 }
  0x10   : > { %p408_p10 = pneg %p407_p9 }
  0x12   : > { %p415_p0 = pnand %p414_p13, %p408_p10 }
  0x14   : > { %418 = shalt.err (!%p415_p0)
}
  0x15   : > { %s447_s20 = smov [#allocation2]   ;;  %146 = sbr.rel (%p484_p3) target bundleno = 54 (0x36), region = 28 }
  0x16   : > { %376 = dma.vmem_to_smem (!%p374_p6), %s121_s18, 16, %s447_s20, [#allocation3]  }
  0x1a   : > { %432 = dma.done.wait (%p488_p4), [#allocation3], 16  }
  0x1b   : > { %434 = vsyncadd (%p488_p4), [#allocation3], 4294967280 }
  0x1c   : > { %152 = sfence }
  0x1d   : > { %p178_p1 = scmp.lt.s32.totalorder %s437_s9, 1  ;;  %s198_s21 = sld [smem:[#allocation2]]  ;;  %v226_v2 = vlaneseq }
  0x1e   : > { %s359_s22 = sld [smem:[#allocation2 + $0x1]] }
  0x1f   : > { %s535_s9 = smov (!%p178_p1, %s437_s9), 1  ;;  %s361_s23 = sld [smem:[#allocation2 + $0x2]]  ;;  %v227_v10 = vshrl.u32 %v226_v2, 7 }
  0x20   : > { %s367_s24 = sshll.u32 %s535_s9, 3  ;;  %s363_s25 = sld [smem:[#allocation2 + $0x3]] }
  0x21   : > { %s185_s28 = scalar_lea.vmem %s525_s0, %s367_s24  ;;  %v228_v16 = vsub.s32 0, %v227_v10  ;;  %v232_v17 = vsub.s32 4, %v227_v10  ;;  %s195_s3 = scalar_lea.vmem %s527_s2, %s367_s24 }
  0x22   : > { %v197_v0 = vld [vmem:[%s185_s28] sm:$0xff] }
  0x23   : > { %v199_v1 = vstv %s198_s21 }
  0x24   : > { %v202_v3 = vstv %s359_s22  ;;  %v200_v4 = vmul.f32 %v199_v1, %v197_v0 }
  0x25   : > { %v203_v5 = vmul.f32 %v202_v3, %v197_v0  ;;  %v210_v6 = vstv %s361_s23 }
  0x26   : > { %v211_v8 = vmul.f32 %v210_v6, %v197_v0  ;;  %v218_v9 = vstv %s363_s25 }
  0x27   : > { %v360_v7 = vrot.slane %v203_v5, 9  ;;  %v219_v11 = vmul.f32 %v218_v9, %v197_v0 }
  0x28   : > { %v362_v13 = vrot.slane %v211_v8, 10 }
  0x29   : > { %v208_v12 = vadd.f32 %v360_v7, %v200_v4  ;;  %v364_v14 = vrot.slane %v219_v11, 11 }
  0x2b   : > { %v216_v15 = vadd.f32 %v362_v13, %v208_v12 }
  0x2d   : > { %v224_v18 = vadd.f32 %v364_v14, %v216_v15 }
  0x2f   : > { %v229_v19 = vrot.slane %v224_v18, %v228_v16  ;;  %v233_v20 = vrot.slane %v224_v18, %v232_v17 }
  0x31   : > { %v239_v21 = vrot.slane %v229_v19, %v228_v16  ;;  %v243_v22 = vrot.slane %v233_v20, %v228_v16 }
  0x33   : > { %v246_v23 = vcombine.low %v239_v21, %v243_v22 }
  0x35   : > { %248 = vst [vmem:[%s195_s3] sm:$0xff] %v246_v23 }
  0x36 PF: > { %s13_s11 = sadd.s32 1, %s445_s11   ;;  %s530_s9 = smov %s441_s10 }
  0x37   : > { %p10_p2 = scmp.ge.s32.totalorder %s13_s11, 4   ;;  %s531_s10 = smov %s533_s13 }
  0x39   :  { %12 = sbr.rel (!%p10_p2) target bundleno = 2 (0x2), region = 63 }
  0x3e   :  { %279 = vsyncpa [#allocation3], 1 }
  0x3f   :  { %281 = vsyncpa [#allocation3 + $0x1], 1 }

</bundles_post_ra>
